<compile_context>
chip_gen: v5e
topology: v5e:2x2
jax: 0.10.0
libtpu: 0.0.40
codegen_flags: <defaults>
</compile_context>

<pallas_src>
import jax
import jax.numpy as jnp
import numpy as np
from jax.experimental import pallas as pl
from jax.experimental.pallas import tpu as pltpu

QPOS_DIM = 28
QVEL_DIM = 27
ACTION_DIM = 21
STATE_DIM = QPOS_DIM + QVEL_DIM          # 55
INPUT_DIM = STATE_DIM + ACTION_DIM       # 76
HIDDEN = 128
FUSED = 2 * HIDDEN                       # 256
OUT_PAD = 128                            # lane-dense padded output width (>= STATE_DIM)
LN_EPS = 1e-5


def _round_up(n, m):
    return -(-n // m) * m


def _fwd_kernel(x_ref, w_comb_ref, w_f1_ref, w_f2_ref, vec_ref, out_ref):
    x = x_ref[...]                                                    # [TB, 76] f32
    # Zero the action columns (reference never reads them); also guards against
    # non-finite action inputs propagating through the zero weight rows.
    col = jax.lax.broadcasted_iota(jnp.int32, x.shape, 1)
    x = jnp.where(col < STATE_DIM, x, 0.0).astype(jnp.bfloat16)

    # packed small vectors (f32): row0=b_comb, row1=ln_gamma, row2=ln_beta,
    # row3 = [b_f1 (128) | b_f2_padded (128)]
    b_comb = vec_ref[0:1, :]
    ln_g = vec_ref[1:2, :]
    ln_b = vec_ref[2:3, :]
    b_f1 = vec_ref[3:4, :HIDDEN]
    b_f2 = vec_ref[3:4, HIDDEN:]

    # folded encoder->v_proj->out_proj:  fused = [qpos_attn | qvel_attn]
    fused = jnp.dot(x, w_comb_ref[...],
                    preferred_element_type=jnp.float32) + b_comb      # [TB, 256] f32

    # fusion_layer: LayerNorm(256) -> ReLU -> Linear(256,128) -> ReLU -> Linear(128,55)
    mean = jnp.mean(fused, axis=-1, keepdims=True)
    var = jnp.mean((fused - mean) ** 2, axis=-1, keepdims=True)
    normed = (fused - mean) * jax.lax.rsqrt(var + LN_EPS) * ln_g + ln_b
    h = jnp.maximum(normed, 0.0).astype(jnp.bfloat16)
    h = jnp.dot(h, w_f1_ref[...], preferred_element_type=jnp.float32) + b_f1
    h = jnp.maximum(h, 0.0).astype(jnp.bfloat16)
    out = jnp.dot(h, w_f2_ref[...], preferred_element_type=jnp.float32) + b_f2
    out_ref[...] = out.astype(out_ref.dtype)                          # [TB, 128] lane-dense


def fuse_params(params):
    """Fold weights host-side (done once) into MXU-shaped bf16 operands + one f32 vector pack."""
    (w_qp, b_qp, w_qv, b_qv, _w_act, _b_act,
     w_v1, b_v1, w_o1, b_o1,
     w_v2, b_v2, w_o2, b_o2,
     ln_g, ln_b, w_f1, b_f1, w_f2, b_f2) = params

    # Exact affine fold (f32 host math):
    #   fused[:, :H] = qpos_attn = qvel @ (w_qv@w_v1@w_o1) + (b_qv@w_v1@w_o1 + b_v1@w_o1 + b_o1)
    #   fused[:, H:] = qvel_attn = qpos @ (w_qp@w_v2@w_o2) + (b_qp@w_v2@w_o2 + b_v2@w_o2 + b_o2)
    w_comb = jnp.zeros((INPUT_DIM, FUSED), jnp.float32)
    w_comb = w_comb.at[QPOS_DIM:STATE_DIM, :HIDDEN].set(w_qv @ w_v1 @ w_o1)
    w_comb = w_comb.at[:QPOS_DIM, HIDDEN:].set(w_qp @ w_v2 @ w_o2)
    b_comb = jnp.concatenate(
        [b_qv @ w_v1 @ w_o1 + b_v1 @ w_o1 + b_o1,
         b_qp @ w_v2 @ w_o2 + b_v2 @ w_o2 + b_o2], axis=-1)            # [1, 256]

    # final projection zero-padded to a lane-dense 128-wide output slab
    w_f2p = jnp.zeros((HIDDEN, OUT_PAD), jnp.float32).at[:, :STATE_DIM].set(w_f2)
    b_f2p = jnp.zeros((1, OUT_PAD), jnp.float32).at[:, :STATE_DIM].set(b_f2)

    # pack all small per-row vectors into a single [8, 256] f32 operand
    vec = jnp.zeros((8, FUSED), jnp.float32)
    vec = vec.at[0:1, :].set(b_comb)
    vec = vec.at[1:2, :].set(ln_g)
    vec = vec.at[2:3, :].set(ln_b)
    vec = vec.at[3:4, :HIDDEN].set(b_f1)
    vec = vec.at[3:4, HIDDEN:].set(b_f2p)

    return (w_comb.astype(jnp.bfloat16),
            w_f1.astype(jnp.bfloat16),
            w_f2p.astype(jnp.bfloat16),
            vec)


def cross_attention_state_predictor(x, params, *, max_batch_tile=1024, return_padded=False):
    B = x.shape[0]
    # >= 2 grid steps for any non-trivial batch so the parallel axis spans both
    # v7x TensorCores; tile chosen near-minimal (multiple of 8) to limit pad waste.
    n_tiles = max(2 if B > 8 else 1, pl.cdiv(B, max_batch_tile))
    tile = _round_up(pl.cdiv(B, n_tiles), 8)
    B_pad = n_tiles * tile
    if B_pad != B:
        x = jnp.pad(x, ((0, B_pad - B), (0, 0)))

    w_comb, w_f1, w_f2p, vec = fuse_params(params)

    def const_spec(shape):
        return pl.BlockSpec(shape, lambda i: (0,) * len(shape))

    in_specs = [
        pl.BlockSpec((tile, INPUT_DIM), lambda i: (i, 0)),
        const_spec(w_comb.shape),
        const_spec(w_f1.shape),
        const_spec(w_f2p.shape),
        const_spec(vec.shape),
    ]
    out_spec = pl.BlockSpec((tile, OUT_PAD), lambda i: (i, 0))

    flops_per_row = 2 * (INPUT_DIM * FUSED + FUSED * HIDDEN + HIDDEN * OUT_PAD)
    weight_bytes = 2 * (INPUT_DIM * FUSED + FUSED * HIDDEN + HIDDEN * OUT_PAD) + 8 * FUSED * 4
    cost = pl.CostEstimate(
        flops=B_pad * flops_per_row,
        transcendentals=B_pad,                                   # one rsqrt per row
        bytes_accessed=B_pad * (INPUT_DIM + OUT_PAD) * 4 + weight_bytes,
    )

    out = pl.pallas_call(
        _fwd_kernel,
        grid=(n_tiles,),
        in_specs=in_specs,
        out_specs=out_spec,
        out_shape=jax.ShapeDtypeStruct((B_pad, OUT_PAD), jnp.float32),
        compiler_params=pltpu.CompilerParams(dimension_semantics=("parallel",)),
        cost_estimate=cost,
    )(x, w_comb, w_f1, w_f2p, vec)

    if return_padded:
        return out          # [B_pad, 128]; rows >= B / cols >= 55 are padding
    return out[:B, :STATE_DIM]


def init_params(key):
    """Deterministic init mimicking PyTorch Linear default (uniform +/- 1/sqrt(fan_in))."""
    def linear(k, fan_in, fan_out):
        bound = 1.0 / float(np.sqrt(fan_in))
        k1, k2 = jax.random.split(k)
        w = jax.random.uniform(k1, (fan_in, fan_out), jnp.float32, -bound, bound)
        b = jax.random.uniform(k2, (1, fan_out), jnp.float32, -bound, bound)
        return w, b

    ks = jax.random.split(key, 10)
    w_qp, b_qp = linear(ks[0], QPOS_DIM, HIDDEN)
    w_qv, b_qv = linear(ks[1], QVEL_DIM, HIDDEN)
    w_act, b_act = linear(ks[2], ACTION_DIM, HIDDEN)   # present in module, unused by forward output
    w_v1, b_v1 = linear(ks[3], HIDDEN, HIDDEN)         # attn_qpos_to_qvel v_proj / out_proj
    w_o1, b_o1 = linear(ks[4], HIDDEN, HIDDEN)
    w_v2, b_v2 = linear(ks[5], HIDDEN, HIDDEN)         # attn_qvel_to_qpos v_proj / out_proj
    w_o2, b_o2 = linear(ks[6], HIDDEN, HIDDEN)
    ln_g = jnp.ones((1, FUSED), jnp.float32)
    ln_b = jnp.zeros((1, FUSED), jnp.float32)
    w_f1, b_f1 = linear(ks[7], FUSED, HIDDEN)
    w_f2, b_f2 = linear(ks[8], HIDDEN, STATE_DIM)
    return [w_qp, b_qp, w_qv, b_qv, w_act, b_act,
            w_v1, b_v1, w_o1, b_o1,
            w_v2, b_v2, w_o2, b_o2,
            ln_g, ln_b,
            w_f1, b_f1, w_f2, b_f2]


def reference_forward(x, params):
    """Pure-JAX f32 reference mirroring the PyTorch forward (eval mode)."""
    (w_qp, b_qp, w_qv, b_qv, _w_act, _b_act,
     w_v1, b_v1, w_o1, b_o1,
     w_v2, b_v2, w_o2, b_o2,
     ln_g, ln_b, w_f1, b_f1, w_f2, b_f2) = params
    qpos, qvel = x[:, :QPOS_DIM], x[:, QPOS_DIM:STATE_DIM]
    qpos_feat = qpos @ w_qp + b_qp
    qvel_feat = qvel @ w_qv + b_qv
    # seq-len-1 cross attention == out_proj(v_proj(value)); dropout is a no-op in eval.
    qpos_attn = (qvel_feat @ w_v1 + b_v1) @ w_o1 + b_o1
    qvel_attn = (qpos_feat @ w_v2 + b_v2) @ w_o2 + b_o2
    fused = jnp.concatenate([qpos_attn, qvel_attn], axis=-1)
    mean = jnp.mean(fused, axis=-1, keepdims=True)
    var = jnp.mean((fused - mean) ** 2, axis=-1, keepdims=True)
    h = (fused - mean) / jnp.sqrt(var + LN_EPS) * ln_g + ln_b
    h = jnp.maximum(h, 0.0)
    h = jnp.maximum(h @ w_f1 + b_f1, 0.0)
    return h @ w_f2 + b_f2


if __name__ == "__main__":
    key = jax.random.PRNGKey(0)
    k_param, k_x = jax.random.split(key)
    params = init_params(k_param)

    # Small, non-multiple-of-8 batch: exercises the padding path and still splits
    # into 2 parallel grid steps (tile=32, B_pad=64) so both v7x TCs get work.
    B = 61
    x = jax.random.normal(k_x, (B, INPUT_DIM), jnp.float32)

    out = cross_attention_state_predictor(x, params)
    out = jax.block_until_ready(out)

    ref = reference_forward(x, params)
    # bf16 MXU dots => relaxed tolerance vs the f32 reference.
    np.testing.assert_allclose(np.asarray(out), np.asarray(ref), rtol=5e-2, atol=5e-2)
    assert out.shape == (B, STATE_DIM)
    print("KERNEL_OK")
</pallas_src>

<mosaic_0001>
module attributes {stable_mosaic.version = 11 : i64} {
  func.func @_fwd_kernel(%arg0: i32, %arg1: memref<32x76xf32, #tpu.memory_space<vmem>>, %arg2: memref<76x256xbf16, #tpu.memory_space<vmem>>, %arg3: memref<256x128xbf16, #tpu.memory_space<vmem>>, %arg4: memref<128x128xbf16, #tpu.memory_space<vmem>>, %arg5: memref<8x256xf32, #tpu.memory_space<vmem>>, %arg6: memref<32x128xf32, #tpu.memory_space<vmem>>) attributes {dimension_semantics = [#tpu.dimension_semantics<parallel>], iteration_bounds = array<i64: 2>, scalar_prefetch = 0 : i64, scratch_operands = 0 : i64, tpu.core_type = #tpu.core_type<tc>, window_params = [{transform_indices = @transform_0, window_bounds = array<i64: 32, 76>}, {pipeline_mode = #tpu.pipeline_mode<synchronous>, transform_indices = @transform_1, window_bounds = array<i64: 76, 256>}, {pipeline_mode = #tpu.pipeline_mode<synchronous>, transform_indices = @transform_2, window_bounds = array<i64: 256, 128>}, {pipeline_mode = #tpu.pipeline_mode<synchronous>, transform_indices = @transform_3, window_bounds = array<i64: 128, 128>}, {pipeline_mode = #tpu.pipeline_mode<synchronous>, transform_indices = @transform_4, window_bounds = array<i64: 8, 256>}, {transform_indices = @transform_5, window_bounds = array<i64: 32, 128>}]} {
    %c0 = arith.constant 0 : index
    %c0_0 = arith.constant 0 : index
    %0 = vector.load %arg1[%c0, %c0_0] : memref<32x76xf32, #tpu.memory_space<vmem>>, vector<32x76xf32>
    %1 = tpu.iota {dimensions = array<i32: 1>} : vector<32x76xi32>
    %c55_i32 = arith.constant 55 : i32
    %2 = vector.broadcast %c55_i32 : i32 to vector<32x76xi32>
    %3 = arith.cmpi slt, %1, %2 : vector<32x76xi32>
    %cst = arith.constant 0.000000e+00 : f32
    %4 = vector.broadcast %cst : f32 to vector<32x76xf32>
    %5 = arith.select %3, %0, %4 : vector<32x76xi1>, vector<32x76xf32>
    %6 = arith.truncf %5 : vector<32x76xf32> to vector<32x76xbf16>
    %c0_1 = arith.constant 0 : index
    %c0_2 = arith.constant 0 : index
    %7 = vector.load %arg5[%c0_1, %c0_2] : memref<8x256xf32, #tpu.memory_space<vmem>>, vector<1x256xf32>
    %c1 = arith.constant 1 : index
    %c0_3 = arith.constant 0 : index
    %8 = vector.load %arg5[%c1, %c0_3] : memref<8x256xf32, #tpu.memory_space<vmem>>, vector<1x256xf32>
    %c2 = arith.constant 2 : index
    %c0_4 = arith.constant 0 : index
    %9 = vector.load %arg5[%c2, %c0_4] : memref<8x256xf32, #tpu.memory_space<vmem>>, vector<1x256xf32>
    %c3 = arith.constant 3 : index
    %c0_5 = arith.constant 0 : index
    %10 = vector.load %arg5[%c3, %c0_5] : memref<8x256xf32, #tpu.memory_space<vmem>>, vector<1x128xf32>
    %c3_6 = arith.constant 3 : index
    %c128 = arith.constant 128 : index
    %11 = vector.load %arg5[%c3_6, %c128] : memref<8x256xf32, #tpu.memory_space<vmem>>, vector<1x128xf32>
    %c0_7 = arith.constant 0 : index
    %c0_8 = arith.constant 0 : index
    %12 = vector.load %arg2[%c0_7, %c0_8] : memref<76x256xbf16, #tpu.memory_space<vmem>>, vector<76x256xbf16>
    %cst_9 = arith.constant dense<0.000000e+00> : vector<32x256xf32>
    %13 = tpu.matmul %6, %12, %cst_9 {dimension_numbers = #tpu.dot_dimension_numbers<[1], [0], [0], [1], [0, 0, 1, 1], [], []>} : vector<32x76xbf16>, vector<76x256xbf16>, vector<32x256xf32> -> vector<32x256xf32>
    %14 = vector.broadcast %7 : vector<1x256xf32> to vector<32x256xf32>
    %15 = arith.addf %13, %14 : vector<32x256xf32>
    %cst_10 = arith.constant dense<0.000000e+00> : vector<32xf32>
    %16 = vector.multi_reduction <add>, %15, %cst_10 [1] : vector<32x256xf32> to vector<32xf32>
    %17 = vector.shape_cast %16 : vector<32xf32> to vector<32x1xf32>
    %cst_11 = arith.constant 2.560000e+02 : f32
    %18 = vector.broadcast %cst_11 : f32 to vector<32x1xf32>
    %19 = arith.divf %17, %18 : vector<32x1xf32>
    %20 = vector.broadcast %19 : vector<32x1xf32> to vector<32x256xf32>
    %21 = arith.subf %15, %20 : vector<32x256xf32>
    %22 = arith.mulf %21, %21 : vector<32x256xf32>
    %cst_12 = arith.constant dense<0.000000e+00> : vector<32xf32>
    %23 = vector.multi_reduction <add>, %22, %cst_12 [1] : vector<32x256xf32> to vector<32xf32>
    %24 = vector.shape_cast %23 : vector<32xf32> to vector<32x1xf32>
    %cst_13 = arith.constant 2.560000e+02 : f32
    %25 = vector.broadcast %cst_13 : f32 to vector<32x1xf32>
    %26 = arith.divf %24, %25 : vector<32x1xf32>
    %27 = vector.broadcast %19 : vector<32x1xf32> to vector<32x256xf32>
    %28 = arith.subf %15, %27 : vector<32x256xf32>
    %cst_14 = arith.constant 9.99999974E-6 : f32
    %29 = vector.broadcast %cst_14 : f32 to vector<32x1xf32>
    %30 = arith.addf %26, %29 : vector<32x1xf32>
    %31 = math.rsqrt %30 : vector<32x1xf32>
    %32 = vector.broadcast %31 : vector<32x1xf32> to vector<32x256xf32>
    %33 = arith.mulf %28, %32 : vector<32x256xf32>
    %34 = vector.broadcast %8 : vector<1x256xf32> to vector<32x256xf32>
    %35 = arith.mulf %33, %34 : vector<32x256xf32>
    %36 = vector.broadcast %9 : vector<1x256xf32> to vector<32x256xf32>
    %37 = arith.addf %35, %36 : vector<32x256xf32>
    %cst_15 = arith.constant 0.000000e+00 : f32
    %38 = vector.broadcast %cst_15 : f32 to vector<32x256xf32>
    %39 = arith.maximumf %37, %38 : vector<32x256xf32>
    %40 = arith.truncf %39 : vector<32x256xf32> to vector<32x256xbf16>
    %c0_16 = arith.constant 0 : index
    %c0_17 = arith.constant 0 : index
    %41 = vector.load %arg3[%c0_16, %c0_17] : memref<256x128xbf16, #tpu.memory_space<vmem>>, vector<256x128xbf16>
    %cst_18 = arith.constant dense<0.000000e+00> : vector<32x128xf32>
    %42 = tpu.matmul %40, %41, %cst_18 {dimension_numbers = #tpu.dot_dimension_numbers<[1], [0], [0], [1], [0, 0, 1, 1], [], []>} : vector<32x256xbf16>, vector<256x128xbf16>, vector<32x128xf32> -> vector<32x128xf32>
    %43 = vector.broadcast %10 : vector<1x128xf32> to vector<32x128xf32>
    %44 = arith.addf %42, %43 : vector<32x128xf32>
    %cst_19 = arith.constant 0.000000e+00 : f32
    %45 = vector.broadcast %cst_19 : f32 to vector<32x128xf32>
    %46 = arith.maximumf %44, %45 : vector<32x128xf32>
    %47 = arith.truncf %46 : vector<32x128xf32> to vector<32x128xbf16>
    %c0_20 = arith.constant 0 : index
    %c0_21 = arith.constant 0 : index
    %48 = vector.load %arg4[%c0_20, %c0_21] : memref<128x128xbf16, #tpu.memory_space<vmem>>, vector<128x128xbf16>
    %cst_22 = arith.constant dense<0.000000e+00> : vector<32x128xf32>
    %49 = tpu.matmul %47, %48, %cst_22 {dimension_numbers = #tpu.dot_dimension_numbers<[1], [0], [0], [1], [0, 0, 1, 1], [], []>} : vector<32x128xbf16>, vector<128x128xbf16>, vector<32x128xf32> -> vector<32x128xf32>
    %50 = vector.broadcast %11 : vector<1x128xf32> to vector<32x128xf32>
    %51 = arith.addf %49, %50 : vector<32x128xf32>
    %c0_23 = arith.constant 0 : index
    %c0_24 = arith.constant 0 : index
    %52 = vector.load %arg6[%c0_23, %c0_24] : memref<32x128xf32, #tpu.memory_space<vmem>>, vector<32x128xf32>
    tpu.vector_store %arg6[%c0_23, %c0_24], %51 {strides = array<i32>} : memref<32x128xf32, #tpu.memory_space<vmem>>, vector<32x128xf32>,
    return
  }
  func.func @transform_0(%arg0: i32) -> (i32, i32) {
    %c0_i32 = arith.constant 0 : i32
    %c0_i32_0 = arith.constant 0 : i32
    return %arg0, %c0_i32 : i32, i32
  }
  func.func @transform_1(%arg0: i32) -> (i32, i32) {
    %c0_i32 = arith.constant 0 : i32
    %c0_i32_0 = arith.constant 0 : i32
    %c0_i32_1 = arith.constant 0 : i32
    return %c0_i32, %c0_i32_0 : i32, i32
  }
  func.func @transform_2(%arg0: i32) -> (i32, i32) {
    %c0_i32 = arith.constant 0 : i32
    %c0_i32_0 = arith.constant 0 : i32
    %c0_i32_1 = arith.constant 0 : i32
    return %c0_i32, %c0_i32_0 : i32, i32
  }
  func.func @transform_3(%arg0: i32) -> (i32, i32) {
    %c0_i32 = arith.constant 0 : i32
    %c0_i32_0 = arith.constant 0 : i32
    %c0_i32_1 = arith.constant 0 : i32
    return %c0_i32, %c0_i32_0 : i32, i32
  }
  func.func @transform_4(%arg0: i32) -> (i32, i32) {
    %c0_i32 = arith.constant 0 : i32
    %c0_i32_0 = arith.constant 0 : i32
    %c0_i32_1 = arith.constant 0 : i32
    return %c0_i32, %c0_i32_0 : i32, i32
  }
  func.func @transform_5(%arg0: i32) -> (i32, i32) {
    %c0_i32 = arith.constant 0 : i32
    %c0_i32_0 = arith.constant 0 : i32
    return %arg0, %c0_i32 : i32, i32
  }
}

</mosaic_0001>

<bundles_post_ra>
// kernel: tpu_custom_call.1
= control target key start
LH: loop header
LB: loop body
LE: loop exit
PB: predicated region body
PF: predicated region fallthrough
CT: control target
= control target key end

     0   :  { %10 = vsyncpa [#allocation3], 0  ;;  %s1800_s0 = inlined_call_operand.hbm [shape: f32[64,76], index: 0, kind: input, shape index: {}]   ;;  %s1801_s1 = inlined_call_operand.hbm [shape: bf16[76,256], index: 1, kind: input, shape index: {}]   ;;  %s1802_s2 = inlined_call_operand.hbm [shape: bf16[256,128], index: 2, kind: input, shape index: {}]   ;;  %s1803_s3 = inlined_call_operand.hbm [shape: bf16[128,128], index: 3, kind: input, shape index: {}]   ;;  %s1804_s4 = inlined_call_operand.hbm [shape: f32[8,256], index: 4, kind: input, shape index: {}]   ;;  %s1805_s5 = inlined_call_operand.hbm [shape: f32[64,128], index: 5, kind: output, shape index: {}]  }
   0x1   :  { %12 = vsyncpa [#allocation3 + $0x1], 0 }
   0x2   :  { %13 = vsyncpa [#allocation6], 0 }
   0x3   :  { %14 = vsyncpa [#allocation9], 0 }
   0x4   :  { %15 = vsyncpa [#allocation4], 0 }
   0x5   :  { %17 = vsyncpa [#allocation4 + $0x1], 0  ;;  %s1555_s18 = smov 0   ;;  %s1557_s19 = smov 0  }
   0x6   :  { %s1559_s20 = smov 0   ;;  %s1561_s21 = smov 0  }
   0x7 LB: > { %s1576_s22 = sadd.s32 4294967295, %s1512_s21   ;;  %s978_s23 = sadd.s32 4294967294, %s1512_s21   ;;  %s1512_s21 = sphi %s1561_s21, %s1818_s21   ;;  %s1508_s20 = sphi %s1559_s20, %s1817_s20   ;;  %s1504_s19 = sphi %s1557_s19, %s1816_s19   ;;  %s1500_s18 = sphi %s1555_s18, %s1815_s18  }
   0x8   : > { %p43_p0 = scmp.ne.s32.totalorder %s1504_s19, %s1500_s18  ;;  %p44_p1 = scmp.eq.s32.totalorder %s1576_s22, 0 }
   0x9   : > { %p151_p2 = scmp.eq.s32.totalorder %s1576_s22, 1  ;;  %p157_p3 = scmp.eq.s32.totalorder %s978_s23, 1 }
   0xa   : > { %p1585_p4 = por %p44_p1, %p43_p0  ;;  %p979_p5 = scmp.ge.s32.totalorder %s1512_s21, 1 }
   0xb   : > { %p1590_p6 = por %p157_p3, %p43_p0  ;;  %p164_p7 = scmp.lt.s32.totalorder %s1512_s21, 3 }
   0xc   : > { %s175_s28 = sshll.u32 %s1801_s1, 4  ;;  %s1514_s30 = smov [#allocation5]   ;;  %s176_s28 = int_to_ptr.hbm [resolvable:$true] %s175_s28 }
   0xd   : > { %p1598_p8 = pnand %p979_p5, %p164_p7  ;;  %s177_s6 = sshll.u32 %s1514_s30, 4  ;;  %s178_s6 = int_to_ptr.vmem [resolvable:$true] %s177_s6 }
   0xe   : > { %s203_s10 = sshll.u32 %s1803_s3, 4  ;;  %s1806_s11 = smov 128   ;;  %s204_s10 = int_to_ptr.hbm [resolvable:$true] %s203_s10 }
   0xf   : > { %p1204_p9 = pneg %p1598_p8  ;;  %s1516_s12 = smov 8  }
  0x10   : > { %s1517_s13 = smov [#allocation8]   ;;  %s189_s17 = sshll.u32 %s1802_s2, 4  ;;  %s190_s17 = int_to_ptr.hbm [resolvable:$true] %s189_s17 }
  0x11   : > { %p1606_p10 = pnand %p1204_p9, %p44_p1  ;;  %s205_s14 = sshll.u32 %s1517_s13, 4  ;;  %s206_s14 = int_to_ptr.vmem [resolvable:$true] %s205_s14 }
  0x12   : > { %s1518_s23 = smov 64   ;;  %s1519_s26 = smov 4  }
  0x13   : > { %1207 = dma.hbm_to_vmem [thread:$0]  (!%p1606_p10), %s176_s28, 1280, %s178_s6, [#allocation6], %s1806_s11, %s1806_s11, %s1516_s12  }
  0x14   : > { %1213 = dma.hbm_to_vmem [thread:$0]  (!%p1606_p10), %s204_s10, 1024, %s206_s14, [#allocation9], %s1518_s23, %s1518_s23, %s1519_s26  }
  0x15   : > { %s218_s30 = sshll.u32 %s1804_s4, 4  ;;  %s1520_s6 = smov [#allocation7]   ;;  %s219_s30 = int_to_ptr.hbm [resolvable:$true] %s218_s30 }
  0x16   : > { %s191_s8 = sshll.u32 %s1520_s6, 4  ;;  %s1521_s9 = smov [#allocation10]   ;;  %s192_s8 = int_to_ptr.vmem [resolvable:$true] %s191_s8 }
  0x17   : > { %1210 = dma.hbm_to_vmem [thread:$0]  (!%p1606_p10), %s190_s17, 2048, %s192_s8, [#allocation6], %s1518_s23, %s1518_s23, %s1519_s26  }
  0x18   : > { %s220_s13 = sshll.u32 %s1521_s9, 4  ;;  %s1632_s10 = sadd.s32 1, %s1512_s21   ;;  %s221_s13 = int_to_ptr.vmem [resolvable:$true] %s220_s13 }
  0x19   : > { %1216 = dma.hbm_to_vmem [thread:$0]  (!%p1606_p10), %s219_s30, 256, %s221_s13, [#allocation9]  }
  0x1a   : > { %s30_s14 = sadd.s32 1, %s1508_s20  ;;  %s27_s15 = ssub.s32 %s1512_s21, %s1632_s10 }
  0x1b   : > { %p37_p12 = scmp.ne.s32.totalorder %s1508_s20, %s1504_s19  ;;  %p28_p13 = scmp.eq.s32.totalorder %s27_s15, 0 }
  0x1c   : > { %p38_p0 = scmp.eq.s32.totalorder %s1512_s21, 0  ;;  %p1229_p5 = scmp.lt.s32.totalorder %s1512_s21, 2 }
  0x1d   : > { %p1642_p3 = por %p151_p2, %p37_p12  ;;  %s231_s23 = sand.u32 1, %s1508_s20  }
  0x1e   : > { %s1648_s17 = scalar_select %p28_p13, %s1508_s20, %s30_s14  }
  0x1f   : > { %p39_p7 = por %p38_p0, %p37_p12  ;;  %s985_s7 = sshll.u32 %s231_s23, 5 }
  0x20   : > { %s1140_s26 = sshll.u32 %s1512_s21, 5  ;;  %s235_s6 = scalar_lea.vmem [#allocation2], %s985_s7 }
  0x21   : > { %s240_s30 = scalar_lea.hbm %s1800_s0, %s1140_s26  ;;  %s243_s8 = sshll.u32 %s235_s6, 4  ;;  %s244_s8 = int_to_ptr.vmem [resolvable:$true] %s243_s8 }
  0x22   : > { %s241_s9 = sshll.u32 %s240_s30, 4  ;;  %p1655_p2 = pnand %p1229_p5, %p39_p7  ;;  %s242_s9 = int_to_ptr.hbm [resolvable:$true] %s241_s9 }
  0x23   : > { %s232_s14 = scalar_lea.sflag [#allocation3], %s231_s23  ;;  %s1408_s15 = sshra.s32 %s242_s9, 4  ;;  %s1409_s15 = int_to_ptr.hbm [resolvable:$true] %s1408_s15 }
  0x24   : > { %s1410_s11 = scalar_lea.hbm %s1409_s15, 32  ;;  %p1412_p10 = pneg %p1655_p2 }
  0x25   : > { %p1411_p9 = scmp.ne.s32.totalorder %s1409_s15, %s1410_s11  ;;  %s1415_s27 = scalar_lea.hbm %s1800_s0, 64 }
  0x26   : > { %p1416_p0 = scmp.lt.s32.totalorder %s1409_s15, %s1800_s0  ;;  %p1417_p5 = scmp.lt.s32.totalorder %s1415_s27, %s1410_s11 }
  0x27   : > { %p1413_p12 = pnand %p1412_p10, %p1411_p9 }
  0x28   : > { %p1418_p7 = por %p1417_p5, %p1416_p0 }
  0x29   : > { %p1414_p13 = pneg %p1413_p12 }
  0x2b   : > { %p1419_p11 = pnand %p1418_p7, %p1414_p13 }
  0x2d   : > { %1422 = shalt.err (!%p1419_p11)
}
  0x2e   : > { %s1813_s23 = smov 128   ;;  %255 = sbr.rel (%p1598_p8) target bundleno = 794 (0x31a), region = 40 }
  0x2f   : > { %1220 = dma.hbm_to_vmem [thread:$0]  (!%p1655_p2), %s242_s9, 512, %s244_s8, %s232_s14, %s1813_s23, %s1813_s23, %s1516_s12  }
  0x30   : > { %s1675_s6 = sand.u32 (!%p1598_p8), 1, %s1504_s19  }
  0x31   : > { %s989_s11 = sshll.u32 (!%p1598_p8), %s1675_s6, 5  ;;  %s258_s15 = scalar_lea.sflag (!%p1598_p8), [#allocation3], %s1675_s6 }
  0x32   : > { %s1681_s26 = scalar_lea.vmem (!%p1598_p8), [#allocation2], %s989_s11 }
  0x33   : > { %1483 = dma.done.wait (%p1585_p4), %s258_s15, 512  }
  0x34   : > { %1485 = vsyncadd (%p1585_p4), %s258_s15, 4294966784 }
  0x35   : > { %1487 = dma.done.wait (%p44_p1), [#allocation6], 3328  }
  0x36   : > { %1489 = vsyncadd (%p44_p1), [#allocation6], 4294963968 }
  0x37   : > { %1491 = dma.done.wait (%p44_p1), [#allocation9], 1280  }
  0x38   : > { %1493 = vsyncadd (%p44_p1), [#allocation9], 4294966016  ;;  %vm402_vm0 = vcmask 1045504   ;;  %v1029_v0 = vld [vmem:[#allocation5 + $0x40] sm:$0xf]  ;;  %v316_v16 = vlaneseq  ;;  %v313_v31 = vld [vmem:[%s1681_s26 + $0x8] sm:$0xff] }
  0x39   : > { %v1150_v1 = vld [vmem:[#allocation5 + $0x44] sm:$0x30]  ;;  %v1149_v2 = vld [vmem:[#allocation5 + $0x44] sm:$0xf]  ;;  %v1031_v4 = vld [vmem:[#allocation5 + $0x48] sm:$0x30] }
  0x3a   : > { %v1030_v3 = vor.u32 %v1150_v1, %v1029_v0  ;;  %v1021_v5 = vld [vmem:[#allocation5 + $0x30] sm:$0xf]  ;;  %v1148_v6 = vld [vmem:[#allocation5 + $0x34] sm:$0xf0]  ;;  %v1034_v7 = vor.u32 %v1149_v2, %v1031_v4  ;;  %v1147_v8 = vld [vmem:[#allocation5 + $0x34] sm:$0xf] }
  0x3b   : > { %v1023_v9 = vld [vmem:[#allocation5 + $0x38] sm:$0xf0]  ;;  %v1022_v12 = vor.u32 %v1148_v6, %v1021_v5  ;;  %v1013_v14 = vld [vmem:[#allocation5 + $0x20] sm:$0xf]  ;;  %v1146_v15 = vld [vmem:[#allocation5 + $0x24] sm:$0xf0] }
  0x3c   : > { %v404_v10 = vsel %vm402_vm0, %v1030_v3, 0  ;;  %v407_v11 = vsel %vm402_vm0, %v1034_v7, 0  ;;  %v1026_v13 = vor.u32 %v1147_v8, %v1023_v9  ;;  %v1145_v17 = vld [vmem:[#allocation5 + $0x24] sm:$0xf]  ;;  %v1015_v18 = vld [vmem:[#allocation5 + $0x28] sm:$0xf0]  ;;  %v1014_v19 = vor.u32 %v1146_v15, %v1013_v14 }
  0x3d   : > { %412 = vmatpush.bf16.msra.mxu0 %v404_v10  ;;  %431 = vmatpush.bf16.msra.mxu1 %v407_v11  ;;  %v1018_v20 = vor.u32 %v1145_v17, %v1015_v18  ;;  %v1005_v21 = vld [vmem:[#allocation5 + $0x10] sm:$0xf]  ;;  %v1144_v22 = vld [vmem:[#allocation5 + $0x14] sm:$0xf0]  ;;  %v317_v23 = vand.u32 127, %v316_v16  ;;  %v312_v27 = vld [vmem:[%s1681_s26] sm:$0xff] }
  0x3e   : > { %v1143_v24 = vld [vmem:[#allocation5 + $0x14] sm:$0xf]  ;;  %v1007_v25 = vld [vmem:[#allocation5 + $0x18] sm:$0xf0]  ;;  %v1006_v26 = vor.u32 %v1144_v22, %v1005_v21  ;;  %v997_v29 = vld [vmem:[#allocation5] sm:$0xf] }
  0x3f   : > { %v1010_v28 = vor.u32 %v1143_v24, %v1007_v25  ;;  %v1142_v30 = vld [vmem:[#allocation5 + $0x4] sm:$0xf0]  ;;  %vm318_vm1 = vcmp.lt.s32.totalorder %v317_v23, 55  ;;  %v1141_v32 = vld [vmem:[#allocation5 + $0x4] sm:$0xf]  ;;  %vm395_vm2 = vcmask 621568  }
  0x40   : > { %v999_v33 = vld [vmem:[#allocation5 + $0x8] sm:$0xf0]  ;;  %v998_v34 = vor.u32 %v1142_v30, %v997_v29  ;;  %v319_v35 = vsel %vm318_vm1, %v312_v27, 0.0  ;;  %v320_v36 = vsel %vm318_vm1, %v313_v31, 0.0  ;;  %v314_v39 = vld [vmem:[%s1681_s26 + $0x10] sm:$0xff]  ;;  %v315_v40 = vld [vmem:[%s1681_s26 + $0x18] sm:$0xff] }
  0x41   : > { %413 = vmatpush.bf16.msra.mxu0 %v1022_v12  ;;  %432 = vmatpush.bf16.msra.mxu1 %v1026_v13  ;;  %v1002_v37 = vor.u32 %v1141_v32, %v999_v33  ;;  %v323_v38 = vpack.c.bf16 %v320_v36, %v319_v35  ;;  %v321_v41 = vsel %vm318_vm1, %v314_v39, 0.0  ;;  %v322_v42 = vsel %vm318_vm1, %v315_v40, 0.0  ;;  %v325_v44 = vld [vmem:[#allocation10] ss:$8 sm:$0x3]  ;;  %v1166_v39 = vld [vmem:[#allocation7 + $0x78] sm:$0xff] }
  0x42   : > { %v324_v43 = vpack.c.bf16 %v322_v42, %v321_v41  ;;  %v343_v45 = vperm.slane %v325_v44, 0  ;;  %v344_v46 = vperm.slane %v325_v44, 1  ;;  %v1522_v3 = vmov 256.0   ;;  %739 = vmatpush.bf16.msra.mxu3 %v1166_v39  ;;  %v1157_v40 = vld [vmem:[#allocation7 + $0x30] sm:$0xff]  ;;  %v1156_v42 = vld [vmem:[#allocation7 + $0x28] sm:$0xff]  ;;  %v1155_v44 = vld [vmem:[#allocation7 + $0x20] sm:$0xff] }
  0x43   : > { %1278 = vrcp.f32 %v1522_v3  ;;  %v1165_v41 = vld [vmem:[#allocation7 + $0x70] sm:$0xff]  ;;  %v1172_v39 = vld [vmem:[#allocation8 + $0x28] sm:$0xff]  ;;  %s308_s24 = scalar_lea.vmem [#allocation11], %s989_s11  ;;  %s1175_s29 = sshll.u32 %s1576_s22, 5 }
  0x44   : > { %s863_s9 = scalar_lea.hbm %s1805_s5, %s1175_s29  ;;  %s864_s13 = sshll.u32 %s308_s24, 4  ;;  %s865_s13 = int_to_ptr.vmem [resolvable:$true] %s864_s13 }
  0x45   : > { %414 = vmatpush.bf16.msra.mxu0 %v1014_v19  ;;  %433 = vmatpush.bf16.msra.mxu1 %v1018_v20  ;;  %s866_s14 = sshll.u32 %s863_s9, 4  ;;  %s852_s7 = scalar_lea.sflag [#allocation4], %s1675_s6  ;;  %s867_s14 = int_to_ptr.hbm [resolvable:$true] %s866_s14 }
  0x46   : > { %740 = vmatpush.bf16.msra.mxu3 %v1165_v41  ;;  %s1452_s27 = sshra.s32 %s867_s14, 4  ;;  %s1458_s23 = scalar_lea.hbm %s1805_s5, 64  ;;  %s1453_s27 = int_to_ptr.hbm [resolvable:$true] %s1452_s27 }
  0x47   : > { %s1454_s28 = scalar_lea.hbm %s1453_s27, 32  ;;  %p1459_p11 = scmp.lt.s32.totalorder %s1453_s27, %s1805_s5 }
  0x48   : > { %p1455_p1 = scmp.ne.s32.totalorder %s1453_s27, %s1454_s28  ;;  %p1460_p2 = scmp.lt.s32.totalorder %s1458_s23, %s1454_s28 }
  0x49   : > { %415 = vmatpush.bf16.msra.mxu0 %v1006_v26  ;;  %434 = vmatpush.bf16.msra.mxu1 %v1010_v28  ;;  %v1279_v4 = vpop.eup %1278 }
  0x4a   : > { %v460_v5 = vmul.f32 256.0, %v1279_v4  ;;  %vm464_vm3 = vweird.f32 %v1279_v4  ;;  %p1456_p4 = pnand %p1455_p1, %p1642_p3  ;;  %p1461_p9 = por %p1460_p2, %p1459_p11 }
  0x4c   : > { %v461_v6 = vsub.f32 1.0, %v460_v5  ;;  %p1457_p8 = pneg %p1456_p4 }
  0x4d   : > { %416 = vmatpush.bf16.msra.mxu0 %v998_v34  ;;  %435 = vmatpush.bf16.msra.mxu1 %v1002_v37 }
  0x4e   : > { %v462_v7 = vmul.f32 %v1279_v4, %v461_v6  ;;  %p1462_p10 = pnand %p1461_p9, %p1457_p8 }
  0x50   : > { %1035 = vmatmul.msk.bf16.vlgmr.msra.gmra.mxu0 %vm395_vm2, %v323_v38  ;;  %1037 = vmatmul.msk.bf16.vlgmr.msra.gmra.mxu1 %vm395_vm2, %v323_v38  ;;  %v463_v8 = vadd.f32 %v1279_v4, %v462_v7  ;;  %v1158_v38 = vld [vmem:[#allocation7 + $0x38] sm:$0xff]  ;;  %v327_v7 = vld [vmem:[#allocation10 + $0x1] ss:$8 sm:$0x3] }
  0x51   : > { %720 = vmatpush.bf16.msra.mxu2 %v1158_v38 }
  0x52   : > { %v1703_v9 = vsel %vm464_vm3, %v1279_v4, %v463_v8 }
  0x55   : > { %721 = vmatpush.bf16.msra.mxu2 %v1157_v40 }
  0x59   : > { %722 = vmatpush.bf16.msra.mxu2 %v1156_v42 }
  0x5d   : > { %723 = vmatpush.bf16.msra.mxu2 %v1155_v44 }
  0x60   : > { %1036 = vmatmul.msk.bf16.gmra.mxu0 %vm395_vm2, %v324_v43  ;;  %1038 = vmatmul.msk.bf16.gmra.mxu1 %vm395_vm2, %v324_v43  ;;  %v1164_v43 = vld [vmem:[#allocation7 + $0x68] sm:$0xff] }
  0x61   : > { %741 = vmatpush.bf16.msra.mxu3 %v1164_v43 }
  0xcd   : > { %v418_v47 = vpop.f32.mrf.mxu0  ;;  %v437_v49 = vpop.f32.mrf.mxu1 }
  0xce   : > { %v419_v48 = vadd.f32 %v418_v47, %v343_v45  ;;  %v438_v50 = vadd.f32 %v437_v49, %v344_v46  ;;  %v1162_v47 = vld [vmem:[#allocation7 + $0x58] sm:$0xff]  ;;  %v1161_v49 = vld [vmem:[#allocation7 + $0x50] sm:$0xff] }
  0xd0   : > { %v447_v51 = vadd.f32 %v438_v50, %v419_v48 }
  0xd2   : > { %448 = vadd.xlane.f32.xlu0 %v447_v51  ;;  %v1152_v51 = vld [vmem:[#allocation7 + $0x8] sm:$0xff] }
  0xd5   : > { %v420_v52 = vpop.f32.mrf.mxu0  ;;  %v439_v54 = vpop.f32.mrf.mxu1 }
  0xd6   : > { %v421_v53 = vadd.f32 %v420_v52, %v343_v45  ;;  %v440_v55 = vadd.f32 %v439_v54, %v344_v46  ;;  %v1160_v52 = vld [vmem:[#allocation7 + $0x48] sm:$0xff] }
  0xd8   : > { %v450_v56 = vadd.f32 %v440_v55, %v421_v53 }
  0xda   : > { %451 = vadd.xlane.f32.xlu0 %v450_v56  ;;  %v1159_v56 = vld [vmem:[#allocation7 + $0x40] sm:$0xff] }
  0xdd   : > { %v423_v57 = vpop.f32.mrf.mxu0  ;;  %v442_v59 = vpop.f32.mrf.mxu1 }
  0xde   : > { %v424_v58 = vadd.f32 %v423_v57, %v343_v45  ;;  %v443_v60 = vadd.f32 %v442_v59, %v344_v46 }
  0xe0   : > { %v453_v61 = vadd.f32 %v443_v60, %v424_v58 }
  0xe2   : > { %454 = vadd.xlane.f32.xlu1 %v453_v61 }
  0xe5   : > { %v425_v62 = vpop.f32.mrf.mxu0  ;;  %v444_v0 = vpop.f32.mrf.mxu1 }
  0xe6   : > { %v426_v63 = vadd.f32 %v425_v62, %v343_v45  ;;  %v445_v1 = vadd.f32 %v444_v0, %v344_v46  ;;  %v1163_v45 = vld [vmem:[#allocation7 + $0x60] sm:$0xff]  ;;  %v1154_v46 = vld [vmem:[#allocation7 + $0x18] sm:$0xff] }
  0xe7   : > { %742 = vmatpush.bf16.msra.mxu3 %v1163_v45  ;;  %724 = vmatpush.bf16.msra.mxu2 %v1154_v46 }
  0xe8   : > { %v456_v2 = vadd.f32 %v445_v1, %v426_v63 }
  0xea   : > { %457 = vadd.xlane.f32.xlu1 %v456_v2 }
  0xeb   : > { %743 = vmatpush.bf16.msra.mxu3 %v1162_v47 }
  0xef   : > { %744 = vmatpush.bf16.msra.mxu3 %v1161_v49  ;;  %v1171_v49 = vld [vmem:[#allocation8 + $0x20] sm:$0xff] }
  0xf3   : > { %745 = vmatpush.bf16.msra.mxu3 %v1160_v52 }
  0xf7   : > { %746 = vmatpush.bf16.msra.mxu3 %v1159_v56 }
 0x145   : > { %v449_v10 = vpop.xlane.xlu0 %448 }
 0x146   : > { %v466_v11 = vmul.f32 %v1703_v9, %v449_v10 }
 0x148   : > { %v1706_v12 = vsub.f32 %v419_v48, %v466_v11  ;;  %v1708_v13 = vsub.f32 %v438_v50, %v466_v11  ;;  %v1153_v48 = vld [vmem:[#allocation7 + $0x10] sm:$0xff] }
 0x149   : > { %725 = vmatpush.bf16.msra.mxu2 %v1153_v48 }
 0x14a   : > { %v478_v14 = vmul.f32 %v1706_v12, %v1706_v12  ;;  %v479_v15 = vmul.f32 %v1708_v13, %v1708_v13 }
 0x14c   : > { %v486_v16 = vadd.f32 %v479_v15, %v478_v14  ;;  %v1744_v15 = vperm.slane %v327_v7, 0 }
 0x14d   : > { %v452_v17 = vpop.xlane.xlu0 %451  ;;  %726 = vmatpush.bf16.msra.mxu2 %v1152_v51 }
 0x14e   : > { %v467_v18 = vmul.f32 %v1703_v9, %v452_v17  ;;  %487 = vadd.xlane.f32.xlu2 %v486_v16  ;;  %v329_v17 = vld [vmem:[#allocation10 + $0x2] ss:$8 sm:$0x3] }
 0x150   : > { %v1715_v19 = vsub.f32 %v421_v53, %v467_v18  ;;  %v1717_v20 = vsub.f32 %v440_v55, %v467_v18  ;;  %v1151_v55 = vld [vmem:[#allocation7] sm:$0xff] }
 0x151   : > { %727 = vmatpush.bf16.msra.mxu2 %v1151_v55 }
 0x152   : > { %v480_v21 = vmul.f32 %v1715_v19, %v1715_v19  ;;  %v481_v22 = vmul.f32 %v1717_v20, %v1717_v20 }
 0x154   : > { %v489_v23 = vadd.f32 %v481_v22, %v480_v21  ;;  %v1749_v22 = vperm.slane %v327_v7, 1 }
 0x155   : > { %v455_v24 = vpop.xlane.xlu1 %454 }
 0x156   : > { %v468_v25 = vmul.f32 %v1703_v9, %v455_v24  ;;  %490 = vadd.xlane.f32.xlu2 %v489_v23  ;;  %v1174_v23 = vld [vmem:[#allocation8 + $0x38] sm:$0xff] }
 0x157   : > { %828 = vmatpush.bf16.msrb.mxu0 %v1174_v23  ;;  %1176 = vmatpush.bf16.msrb.mxu1 %v1174_v23  ;;  %v330_v23 = vld [vmem:[#allocation10 + $0x3] ss:$0 sm:$0xff] }
 0x158   : > { %v1724_v26 = vsub.f32 %v424_v58, %v468_v25  ;;  %v1726_v27 = vsub.f32 %v443_v60, %v468_v25 }
 0x15a   : > { %v482_v28 = vmul.f32 %v1724_v26, %v1724_v26  ;;  %v483_v29 = vmul.f32 %v1726_v27, %v1726_v27 }
 0x15c   : > { %v492_v30 = vadd.f32 %v483_v29, %v482_v28  ;;  %v1173_v29 = vld [vmem:[#allocation8 + $0x30] sm:$0xff] }
 0x15d   : > { %v458_v31 = vpop.xlane.xlu1 %457  ;;  %829 = vmatpush.bf16.msrb.mxu0 %v1173_v29  ;;  %1177 = vmatpush.bf16.msrb.mxu1 %v1173_v29 }
 0x15e   : > { %v469_v32 = vmul.f32 %v1703_v9, %v458_v31  ;;  %493 = vadd.xlane.f32.xlu0 %v492_v30 }
 0x160   : > { %v1733_v33 = vsub.f32 %v426_v63, %v469_v32  ;;  %v1735_v34 = vsub.f32 %v445_v1, %v469_v32  ;;  %v568_v32 = vperm.slane %v329_v17, 0 }
 0x161   : > { %830 = vmatpush.bf16.msrb.mxu0 %v1172_v39  ;;  %1178 = vmatpush.bf16.msrb.mxu1 %v1172_v39 }
 0x162   : > { %v484_v35 = vmul.f32 %v1733_v33, %v1733_v33  ;;  %v485_v36 = vmul.f32 %v1735_v34, %v1735_v34 }
 0x164   : > { %v495_v37 = vadd.f32 %v485_v36, %v484_v35 }
 0x165   : > { %831 = vmatpush.bf16.msrb.mxu0 %v1171_v49  ;;  %1179 = vmatpush.bf16.msrb.mxu1 %v1171_v49 }
 0x166   : > { %496 = vadd.xlane.f32.xlu1 %v495_v37 }
 0x1c1   : > { %v488_v50 = vpop.xlane.xlu2 %487 }
 0x1c2   : > { %v498_v53 = vmul.f32 %v488_v50, %v1703_v9 }
 0x1c4   : > { %v502_v54 = vadd.f32 1e-05, %v498_v53 }
 0x1c6   : > { %1280 = vrsqrt.f32 %v502_v54  ;;  %vm512_vm5 = vweird.f32 %v502_v54 }
 0x1c9   : > { %v491_v57 = vpop.xlane.xlu2 %490 }
 0x1ca   : > { %v499_v58 = vmul.f32 %v491_v57, %v1703_v9 }
 0x1cc   : > { %v1281_v59 = vpop.eup %1280  ;;  %v503_v60 = vadd.f32 1e-05, %v499_v58 }
 0x1cd   : > { %v507_v61 = vmul.f32 %v1281_v59, %v502_v54  ;;  %vm513_vm4 = vweird.f32 %v1281_v59 }
 0x1ce   : > { %1282 = vrsqrt.f32 %v503_v60  ;;  %vm514_vm6 = vmor %vm512_vm5, %vm513_vm4  ;;  %vm522_vm8 = vweird.f32 %v503_v60 }
 0x1cf   : > { %v508_v62 = vmul.f32 %v1281_v59, %v507_v61 }
 0x1d1   : > { %v509_v63 = vmul.f32 0.5, %v508_v62  ;;  %v494_v0 = vpop.xlane.xlu0 %493 }
 0x1d2   : > { %v500_v1 = vmul.f32 %v494_v0, %v1703_v9 }
 0x1d3   : > { %v510_v2 = vsub.f32 1.5, %v509_v63 }
 0x1d4   : > { %v1283_v3 = vpop.eup %1282  ;;  %v504_v4 = vadd.f32 1e-05, %v500_v1 }
 0x1d5   : > { %v511_v5 = vmul.f32 %v1281_v59, %v510_v2  ;;  %v517_v6 = vmul.f32 %v1283_v3, %v503_v60  ;;  %vm523_vm7 = vweird.f32 %v1283_v3 }
 0x1d6   : > { %1284 = vrsqrt.f32 %v504_v4  ;;  %vm524_vm9 = vmor %vm522_vm8, %vm523_vm7  ;;  %vm532_vm11 = vweird.f32 %v504_v4 }
 0x1d7   : > { %v515_v8 = vsel %vm514_vm6, %v1281_v59, %v511_v5  ;;  %v518_v10 = vmul.f32 %v1283_v3, %v517_v6 }
 0x1d8   : > { %v546_v18 = vmul.f32 %v515_v8, %v1706_v12  ;;  %v547_v21 = vmul.f32 %v515_v8, %v1708_v13  ;;  %v569_v13 = vperm.slane %v329_v17, 1 }
 0x1d9   : > { %v519_v11 = vmul.f32 0.5, %v518_v10  ;;  %v497_v14 = vpop.xlane.xlu1 %496 }
 0x1da   : > { %v501_v16 = vmul.f32 %v497_v14, %v1703_v9  ;;  %v559_v9 = vmul.f32 %v1744_v15, %v546_v18  ;;  %v560_v12 = vmul.f32 %v1749_v22, %v547_v21  ;;  %v1170_v18 = vld [vmem:[#allocation8 + $0x18] sm:$0xff] }
 0x1db   : > { %v520_v24 = vsub.f32 1.5, %v519_v11  ;;  %832 = vmatpush.bf16.msrb.mxu0 %v1170_v18  ;;  %1180 = vmatpush.bf16.msrb.mxu1 %v1170_v18 }
 0x1dc   : > { %v1285_v25 = vpop.eup %1284  ;;  %v505_v28 = vadd.f32 1e-05, %v501_v16  ;;  %v572_v42 = vadd.f32 %v568_v32, %v559_v9  ;;  %v573_v44 = vadd.f32 %v569_v13, %v560_v12 }
 0x1dd   : > { %v521_v30 = vmul.f32 %v1283_v3, %v520_v24  ;;  %v527_v31 = vmul.f32 %v1285_v25, %v504_v4  ;;  %vm533_vm10 = vweird.f32 %v1285_v25 }
 0x1de   : > { %1286 = vrsqrt.f32 %v505_v28  ;;  %vm534_vm12 = vmor %vm532_vm11, %vm533_vm10  ;;  %v580_v50 = vmax.f32 %v572_v42, 0.0  ;;  %v581_v52 = vmax.f32 %v573_v44, 0.0  ;;  %vm542_vm14 = vweird.f32 %v505_v28 }
 0x1df   : > { %v525_v35 = vsel %vm524_vm9, %v1283_v3, %v521_v30  ;;  %v528_v36 = vmul.f32 %v1285_v25, %v527_v31 }
 0x1e0   : > { %v548_v37 = vmul.f32 %v525_v35, %v1715_v19  ;;  %v549_v38 = vmul.f32 %v525_v35, %v1717_v20 }
 0x1e1   : > { %v529_v40 = vmul.f32 0.5, %v528_v36 }
 0x1e2   : > { %v561_v41 = vmul.f32 %v1744_v15, %v548_v37  ;;  %v562_v43 = vmul.f32 %v1749_v22, %v549_v38 }
 0x1e3   : > { %v530_v45 = vsub.f32 1.5, %v529_v40 }
 0x1e4   : > { %v1287_v46 = vpop.eup %1286  ;;  %v574_v47 = vadd.f32 %v568_v32, %v561_v41  ;;  %v575_v48 = vadd.f32 %v569_v13, %v562_v43 }
 0x1e5   : > { %v531_v19 = vmul.f32 %v1285_v25, %v530_v45  ;;  %v537_v20 = vmul.f32 %v1287_v46, %v505_v28  ;;  %vm543_vm13 = vweird.f32 %v1287_v46  ;;  %v331_v45 = vld [vmem:[#allocation10 + $0xb] ss:$0 sm:$0xff] }
 0x1e6   : > { %v582_v51 = vmax.f32 %v574_v47, 0.0  ;;  %v583_v53 = vmax.f32 %v575_v48, 0.0  ;;  %vm544_vm15 = vmor %vm542_vm14, %vm543_vm13 }
 0x1e7   : > { %v535_v54 = vsel %vm534_vm12, %v1285_v25, %v531_v19  ;;  %v538_v55 = vmul.f32 %v1287_v46, %v537_v20 }
 0x1e8   : > { %v588_v56 = vpack.c.bf16 %v582_v51, %v580_v50  ;;  %v589_v57 = vpack.c.bf16 %v583_v53, %v581_v52  ;;  %v550_v59 = vmul.f32 %v535_v54, %v1724_v26  ;;  %v551_v60 = vmul.f32 %v535_v54, %v1726_v27 }
 0x1e9   : > { %v539_v58 = vmul.f32 0.5, %v538_v55 }
 0x1ea   : > { %728 = vmatmul.bf16.vlgmr.msra.gmra.mxu2 %v588_v56  ;;  %747 = vmatmul.bf16.vlgmr.msra.gmra.mxu3 %v589_v57  ;;  %v563_v63 = vmul.f32 %v1744_v15, %v550_v59  ;;  %v564_v0 = vmul.f32 %v1749_v22, %v551_v60 }
 0x1eb   : > { %v540_v61 = vsub.f32 1.5, %v539_v58 }
 0x1ec   : > { %v576_v5 = vadd.f32 %v568_v32, %v563_v63  ;;  %v577_v27 = vadd.f32 %v569_v13, %v564_v0 }
 0x1ed   : > { %v541_v62 = vmul.f32 %v1287_v46, %v540_v61 }
 0x1ee   : > { %v584_v8 = vmax.f32 %v576_v5, 0.0  ;;  %v585_v11 = vmax.f32 %v577_v27, 0.0 }
 0x1ef   : > { %v545_v1 = vsel %vm544_vm15, %v1287_v46, %v541_v62 }
 0x1f0   : > { %v552_v2 = vmul.f32 %v545_v1, %v1733_v33  ;;  %v553_v3 = vmul.f32 %v545_v1, %v1735_v34  ;;  %v1169_v33 = vld [vmem:[#allocation8 + $0x10] sm:$0xff]  ;;  %v1168_v34 = vld [vmem:[#allocation8 + $0x8] sm:$0xff] }
 0x1f1   : > { %833 = vmatpush.bf16.msrb.mxu0 %v1169_v33  ;;  %1181 = vmatpush.bf16.msrb.mxu1 %v1169_v33 }
 0x1f2   : > { %v565_v4 = vmul.f32 %v1744_v15, %v552_v2  ;;  %v566_v26 = vmul.f32 %v1749_v22, %v553_v3  ;;  %v1167_v15 = vld [vmem:[#allocation8] sm:$0xff] }
 0x1f4   : > { %v578_v6 = vadd.f32 %v568_v32, %v565_v4  ;;  %v579_v7 = vadd.f32 %v569_v13, %v566_v26 }
 0x1f5   : > { %834 = vmatpush.bf16.msrb.mxu0 %v1168_v34  ;;  %1182 = vmatpush.bf16.msrb.mxu1 %v1168_v34 }
 0x1f6   : > { %v586_v10 = vmax.f32 %v578_v6, 0.0  ;;  %v587_v14 = vmax.f32 %v579_v7, 0.0 }
 0x1f8   : > { %v590_v16 = vpack.c.bf16 %v586_v10, %v584_v8  ;;  %v591_v17 = vpack.c.bf16 %v587_v14, %v585_v11 }
 0x1f9   : > { %835 = vmatpush.bf16.msrb.mxu0 %v1167_v15  ;;  %1183 = vmatpush.bf16.msrb.mxu1 %v1167_v15 }
 0x1fa   : > { %733 = vmatmul.bf16.gmra.mxu2 %v590_v16  ;;  %752 = vmatmul.bf16.gmra.mxu3 %v591_v17 }
 0x26d   : > { %v729_v21 = vpop.f32.mrf.mxu2  ;;  %v748_v22 = vpop.f32.mrf.mxu3 }
 0x26e   : > { %v730_v24 = vadd.f32 %v729_v21, %v330_v23 }
 0x270   : > { %v749_v29 = vadd.f32 %v748_v22, %v730_v24 }
 0x272   : > { %v758_v32 = vmax.f32 %v749_v29, 0.0 }
 0x275   : > { %v731_v25 = vpop.f32.mrf.mxu2  ;;  %v750_v28 = vpop.f32.mrf.mxu3 }
 0x276   : > { %v732_v30 = vadd.f32 %v731_v25, %v330_v23 }
 0x278   : > { %v751_v31 = vadd.f32 %v750_v28, %v732_v30 }
 0x27a   : > { %v759_v9 = vmax.f32 %v751_v31, 0.0 }
 0x27c   : > { %v762_v12 = vpack.c.bf16 %v759_v9, %v758_v32 }
 0x27d   : > { %v734_v13 = vpop.f32.mrf.mxu2  ;;  %v753_v35 = vpop.f32.mrf.mxu3 }
 0x27e   : > { %836 = vmatmul.bf16.vlgmr.msrb.gmra.mxu0 %v762_v12  ;;  %v735_v36 = vadd.f32 %v734_v13, %v330_v23 }
 0x280   : > { %v754_v38 = vadd.f32 %v753_v35, %v735_v36 }
 0x282   : > { %v760_v42 = vmax.f32 %v754_v38, 0.0 }
 0x285   : > { %v736_v37 = vpop.f32.mrf.mxu2  ;;  %v755_v40 = vpop.f32.mrf.mxu3 }
 0x286   : > { %v737_v39 = vadd.f32 %v736_v37, %v330_v23 }
 0x288   : > { %v756_v41 = vadd.f32 %v755_v40, %v737_v39 }
 0x28a   : > { %v761_v43 = vmax.f32 %v756_v41, 0.0 }
 0x28c   : > { %v763_v44 = vpack.c.bf16 %v761_v43, %v760_v42 }
 0x28e   : > { %841 = vmatmul.bf16.vlgmr.msrb.gmra.mxu1 %v763_v44 }
 0x2fb   : > { %v837_v46 = vpop.f32.mrf.mxu0 }
 0x2fc   : > { %v838_v47 = vadd.f32 %v837_v46, %v331_v45 }
 0x2fe   : > { %847 = vst [vmem:[%s308_s24] sm:$0xff] %v838_v47 }
 0x303   : > { %v839_v48 = vpop.f32.mrf.mxu0 }
 0x304   : > { %v840_v49 = vadd.f32 %v839_v48, %v331_v45 }
 0x306   : > { %848 = vst [vmem:[%s308_s24 + $0x8] sm:$0xff] %v840_v49 }
 0x30b   : > { %v842_v19 = vpop.f32.mrf.mxu1 }
 0x30c   : > { %v843_v20 = vadd.f32 %v842_v19, %v331_v45 }
 0x30e   : > { %849 = vst [vmem:[%s308_s24 + $0x10] sm:$0xff] %v843_v20 }
 0x313   : > { %v844_v50 = vpop.f32.mrf.mxu1 }
 0x314   : > { %v845_v51 = vadd.f32 %v844_v50, %v331_v45 }
 0x316   : > { %850 = vst [vmem:[%s308_s24 + $0x18] sm:$0xff] %v845_v51 }
 0x317   : > { %1465 = shalt.err (!%p1462_p10)
}
 0x318   : > { %s1523_s6 = smov 128   ;;  %s1524_s26 = smov 8  }
 0x319   : > { %1202 = dma.vmem_to_hbm [thread:$0]  (%p1642_p3), %s865_s13, 512, %s867_s14, %s852_s7, %s1523_s6, %s1523_s6, %s1524_s26  }
 0x31a PF: > { %s881_s24 = sand.u32 1, %s1500_s18   ;;  %p1814_p12 = scmp.ge.s32.totalorder %s1512_s21, 2 }
 0x31b   : > { %s882_s29 = scalar_lea.sflag [#allocation4], %s881_s24 }
 0x31c   : > { %p1222_p13 = pnand %p1814_p12, %p1590_p6 }
 0x31e   : > { %p1223_p0 = pneg %p1222_p13 }
 0x320   : > { %1495 = dma.done.wait (%p1223_p0), %s882_s29, 512  }
 0x321   : > { %1497 = vsyncadd (%p1223_p0), %s882_s29, 4294966784  ;;  %p20_p5 = scmp.ge.s32.totalorder %s1632_s10, 4   ;;  %s1815_s18 = smov %s1504_s19 }
 0x322   : > { %s1816_s19 = smov %s1508_s20  ;;  %s1817_s20 = smov %s1648_s17 }
 0x323   : > { %s1818_s21 = smov %s1632_s10  ;;  %22 = sbr.rel (!%p20_p5) target bundleno = 7 (0x7), region = 103 }
 0x328   :  { %888 = vsyncpa [#allocation3], 1 }
 0x329   :  { %890 = vsyncpa [#allocation3 + $0x1], 1 }
 0x32a   :  { %891 = vsyncpa [#allocation6], 1 }
 0x32b   :  { %892 = vsyncpa [#allocation9], 1 }
 0x32c   :  { %893 = vsyncpa [#allocation4], 1 }
 0x32d   :  { %895 = vsyncpa [#allocation4 + $0x1], 1 }

</bundles_post_ra>
